<compile_context>
chip_gen: v7x
topology: tpu7x:2x2x1
jax: 0.10.0
libtpu: 0.0.40
codegen_flags: <defaults>
</compile_context>

<pallas_src>
import jax
import jax.numpy as jnp
from jax.experimental import pallas as pl
from jax.experimental.pallas import tpu as pltpu


def _round_up(x: int, m: int) -> int:
    return ((x + m - 1) // m) * m


def fc_kernel(x_ref, w_ref, b_ref, o_ref, acc_ref):
    """One (tm, tn) output tile; K is reduced across grid axis 2."""
    k = pl.program_id(2)

    @pl.when(k == 0)
    def _init():
        # Initialize the f32 accumulator with the broadcast bias so the bias
        # is added exactly once per output tile.
        acc_ref[...] = jnp.broadcast_to(
            b_ref[...].astype(jnp.float32), acc_ref.shape
        )

    acc_ref[...] += jnp.dot(
        x_ref[...], w_ref[...], preferred_element_type=jnp.float32
    )

    @pl.when(k == pl.num_programs(2) - 1)
    def _finalize():
        o_ref[...] = acc_ref[...].astype(o_ref.dtype)


def fc_bottleneck(x, w_t, b, *, tm=256, tn=512, tk=512,
                  compute_dtype=jnp.bfloat16):
    """Fused linear: x @ w_t + b.

    x:   [B, Din]
    w_t: [Din, Dout]   (PyTorch weight [Dout, Din], pre-transposed)
    b:   [Dout] or [1, Dout]
    returns [B, Dout] in x.dtype.
    """
    B, Din = x.shape
    Din_w, Dout = w_t.shape
    assert Din == Din_w, (Din, Din_w)
    out_dtype = x.dtype

    if compute_dtype is not None:
        x = x.astype(compute_dtype)
        w_t = w_t.astype(compute_dtype)
    b = jnp.reshape(b, (1, Dout)).astype(jnp.float32)  # bias add stays f32

    # Shrink tiles for small problems (sublane multiple of 8, lane multiple
    # of 128) so the demo shape is still a single lane-dense tile.
    tm = min(tm, _round_up(B, 8))
    tn = min(tn, _round_up(Dout, 128))
    tk = min(tk, _round_up(Din, 128))

    # Zero-pad to tile multiples; zeros contribute nothing to the matmul and
    # the padded output columns/rows are sliced away below.
    Bp = _round_up(B, tm)
    Kp = _round_up(Din, tk)
    Np = _round_up(Dout, tn)
    if (Bp, Kp) != (B, Din):
        x = jnp.pad(x, ((0, Bp - B), (0, Kp - Din)))
    if (Kp, Np) != (Din, Dout):
        w_t = jnp.pad(w_t, ((0, Kp - Din), (0, Np - Dout)))
    if Np != Dout:
        b = jnp.pad(b, ((0, 0), (0, Np - Dout)))

    grid = (Bp // tm, Np // tn, Kp // tk)

    itemsize = lambda a: jnp.dtype(a.dtype).itemsize
    cost = pl.CostEstimate(
        flops=2 * Bp * Kp * Np,
        transcendentals=0,
        bytes_accessed=(x.size * itemsize(x)
                        + w_t.size * itemsize(w_t)
                        + b.size * itemsize(b)
                        + Bp * Np * jnp.dtype(out_dtype).itemsize),
    )

    out = pl.pallas_call(
        fc_kernel,
        out_shape=jax.ShapeDtypeStruct((Bp, Np), out_dtype),
        grid_spec=pltpu.PrefetchScalarGridSpec(
            num_scalar_prefetch=0,
            grid=grid,
            in_specs=[
                pl.BlockSpec((tm, tk), lambda i, j, k: (i, k)),   # x tile
                pl.BlockSpec((tk, tn), lambda i, j, k: (k, j)),   # w_t tile
                pl.BlockSpec((1, tn), lambda i, j, k: (0, j)),    # bias tile
            ],
            out_specs=pl.BlockSpec((tm, tn), lambda i, j, k: (i, j)),
            scratch_shapes=[pltpu.VMEM((tm, tn), jnp.float32)],
        ),
        compiler_params=pltpu.CompilerParams(
            dimension_semantics=("parallel", "parallel", "arbitrary"),
            vmem_limit_bytes=32 * 1024 * 1024,
        ),
        cost_estimate=cost,
    )(x, w_t, b)

    return out[:B, :Dout]


def init_params(key, in_features, out_features, dtype=jnp.float32):
    """Matches init_weights_normal: kaiming_normal_(nonlinearity='relu',
    mode='fan_in') -> std = sqrt(2 / fan_in); bias zero-initialized."""
    std = jnp.sqrt(2.0 / in_features).astype(dtype)
    # PyTorch weight shape is (out, in); generate that way then transpose.
    w = jax.random.normal(key, (out_features, in_features), dtype=dtype) * std
    w_t = jnp.transpose(w)                        # [in_features, out_features]
    b = jnp.zeros((out_features,), dtype=dtype)
    return w_t, b


def _reference(x, w_t, b, compute_dtype=jnp.bfloat16):
    """Plain-JAX reference of the same math / same casts as the kernel."""
    if compute_dtype is not None:
        x = x.astype(compute_dtype)
        w_t = w_t.astype(compute_dtype)
    acc = jnp.dot(x, w_t, preferred_element_type=jnp.float32)
    return (acc + b.astype(jnp.float32)[None, :]).astype(jnp.float32)


if __name__ == "__main__":
    key = jax.random.PRNGKey(0)
    kx, kw, kx2, kw2 = jax.random.split(key, 4)

    # --- demo shape consistent with the module (single-tile fast path) ---
    batch, in_features, out_features = 8, 32, 64
    x = jax.random.normal(kx, (batch, in_features), dtype=jnp.float32)
    w_t, b = init_params(kw, in_features, out_features)

    y = fc_bottleneck(x, w_t, b)
    jax.block_until_ready(y)
    y_ref = _reference(x, w_t, b).astype(x.dtype)
    assert y.shape == (batch, out_features)
    assert jnp.allclose(y, y_ref, atol=1e-4, rtol=1e-4)

    # --- slightly larger check to exercise the tiled (i, j, k) path ---
    B2, Din2, Dout2 = 256, 384, 256
    x2 = jax.random.normal(kx2, (B2, Din2), dtype=jnp.float32)
    w_t2, b2 = init_params(kw2, Din2, Dout2)
    b2 = b2 + 0.1  # non-zero bias to verify the bias-added-once semantics

    y2 = fc_bottleneck(x2, w_t2, b2, tm=128, tn=128, tk=128)  # grid (2, 2, 3)
    jax.block_until_ready(y2)
    y2_ref = _reference(x2, w_t2, b2).astype(x2.dtype)
    assert y2.shape == (B2, Dout2)
    assert jnp.allclose(y2, y2_ref, atol=2e-4, rtol=2e-4)

    print("KERNEL_OK")
</pallas_src>

<mosaic_0001>
module attributes {stable_mosaic.version = 11 : i64} {
  func.func @fc_kernel(%arg0: i32, %arg1: i32, %arg2: i32, %arg3: memref<8x128xbf16, #tpu.memory_space<vmem>>, %arg4: memref<128x128xbf16, #tpu.memory_space<vmem>>, %arg5: memref<1x128xf32, #tpu.memory_space<vmem>>, %arg6: memref<8x128xf32, #tpu.memory_space<vmem>>, %arg7: memref<8x128xf32, #tpu.memory_space<vmem>>) attributes {dimension_semantics = [#tpu.dimension_semantics<parallel>, #tpu.dimension_semantics<parallel>, #tpu.dimension_semantics<arbitrary>], iteration_bounds = array<i64: 1, 1, 1>, scalar_prefetch = 0 : i64, scratch_operands = 1 : i64, tpu.core_type = #tpu.core_type<tc>, window_params = [{transform_indices = @transform_0, window_bounds = array<i64: 8, 128>}, {transform_indices = @transform_1, window_bounds = array<i64: 128, 128>}, {transform_indices = @transform_2, window_bounds = array<i64: 1, 128>}, {transform_indices = @transform_3, window_bounds = array<i64: 8, 128>}]} {
    %c0_i32 = arith.constant 0 : i32
    %0 = arith.cmpi eq, %arg2, %c0_i32 : i32
    %1 = arith.extui %0 : i1 to i32
    %c0_i32_0 = arith.constant 0 : i32
    %2 = arith.cmpi ne, %1, %c0_i32_0 : i32
    scf.if %2 {
      %c0_10 = arith.constant 0 : index
      %c0_11 = arith.constant 0 : index
      %12 = vector.load %arg5[%c0_10, %c0_11] : memref<1x128xf32, #tpu.memory_space<vmem>>, vector<1x128xf32>
      %13 = vector.shape_cast %12 : vector<1x128xf32> to vector<1x128xf32>
      %14 = vector.broadcast %13 : vector<1x128xf32> to vector<8x128xf32>
      %c0_12 = arith.constant 0 : index
      %c0_13 = arith.constant 0 : index
      %15 = vector.load %arg7[%c0_12, %c0_13] : memref<8x128xf32, #tpu.memory_space<vmem>>, vector<8x128xf32>
      tpu.vector_store %arg7[%c0_12, %c0_13], %14 {strides = array<i32>} : memref<8x128xf32, #tpu.memory_space<vmem>>, vector<8x128xf32>,
    } else {
    }
    %c0 = arith.constant 0 : index
    %c0_1 = arith.constant 0 : index
    %3 = vector.load %arg7[%c0, %c0_1] : memref<8x128xf32, #tpu.memory_space<vmem>>, vector<8x128xf32>
    %c0_2 = arith.constant 0 : index
    %c0_3 = arith.constant 0 : index
    %4 = vector.load %arg3[%c0_2, %c0_3] : memref<8x128xbf16, #tpu.memory_space<vmem>>, vector<8x128xbf16>
    %c0_4 = arith.constant 0 : index
    %c0_5 = arith.constant 0 : index
    %5 = vector.load %arg4[%c0_4, %c0_5] : memref<128x128xbf16, #tpu.memory_space<vmem>>, vector<128x128xbf16>
    %cst = arith.constant dense<0.000000e+00> : vector<8x128xf32>
    %6 = tpu.matmul %4, %5, %cst {dimension_numbers = #tpu.dot_dimension_numbers<[1], [0], [0], [1], [0, 0, 1, 1], [], []>} : vector<8x128xbf16>, vector<128x128xbf16>, vector<8x128xf32> -> vector<8x128xf32>
    %7 = arith.addf %3, %6 : vector<8x128xf32>
    %c0_6 = arith.constant 0 : index
    %c0_7 = arith.constant 0 : index
    %8 = vector.load %arg7[%c0_6, %c0_7] : memref<8x128xf32, #tpu.memory_space<vmem>>, vector<8x128xf32>
    tpu.vector_store %arg7[%c0_6, %c0_7], %7 {strides = array<i32>} : memref<8x128xf32, #tpu.memory_space<vmem>>, vector<8x128xf32>,
    %c0_i32_8 = arith.constant 0 : i32
    %9 = arith.cmpi eq, %arg2, %c0_i32_8 : i32
    %10 = arith.extui %9 : i1 to i32
    %c0_i32_9 = arith.constant 0 : i32
    %11 = arith.cmpi ne, %10, %c0_i32_9 : i32
    scf.if %11 {
      %c0_10 = arith.constant 0 : index
      %c0_11 = arith.constant 0 : index
      %12 = vector.load %arg7[%c0_10, %c0_11] : memref<8x128xf32, #tpu.memory_space<vmem>>, vector<8x128xf32>
      %c0_12 = arith.constant 0 : index
      %c0_13 = arith.constant 0 : index
      %13 = vector.load %arg6[%c0_12, %c0_13] : memref<8x128xf32, #tpu.memory_space<vmem>>, vector<8x128xf32>
      tpu.vector_store %arg6[%c0_12, %c0_13], %12 {strides = array<i32>} : memref<8x128xf32, #tpu.memory_space<vmem>>, vector<8x128xf32>,
    } else {
    }
    return
  }
  func.func @transform_0(%arg0: i32, %arg1: i32, %arg2: i32) -> (i32, i32) {
    %c0_i32 = arith.constant 0 : i32
    return %arg0, %arg2 : i32, i32
  }
  func.func @transform_1(%arg0: i32, %arg1: i32, %arg2: i32) -> (i32, i32) {
    %c0_i32 = arith.constant 0 : i32
    return %arg2, %arg1 : i32, i32
  }
  func.func @transform_2(%arg0: i32, %arg1: i32, %arg2: i32) -> (i32, i32) {
    %c0_i32 = arith.constant 0 : i32
    %c0_i32_0 = arith.constant 0 : i32
    return %c0_i32, %arg1 : i32, i32
  }
  func.func @transform_3(%arg0: i32, %arg1: i32, %arg2: i32) -> (i32, i32) {
    %c0_i32 = arith.constant 0 : i32
    return %arg0, %arg1 : i32, i32
  }
}

</mosaic_0001>

<bundles_post_ra>
// kernel: tpu_custom_call.1
= control target key start
LH: loop header
LB: loop body
LE: loop exit
PB: predicated region body
PF: predicated region fallthrough
CT: control target
= control target key end

     0   :  { %8 = vsyncpa [#allocation4], 0  ;;  %s381_s0 = inlined_call_operand.hbm [shape: bf16[8,128], index: 0, kind: input, shape index: {}]   ;;  %s382_s1 = inlined_call_operand.hbm [shape: bf16[128,128], index: 1, kind: input, shape index: {}]   ;;  %s383_s2 = inlined_call_operand.vmem [shape: f32[1,128], index: 2, kind: input, shape index: {}]   ;;  %s384_s3 = inlined_call_operand.hbm [shape: f32[8,128], index: 3, kind: output, shape index: {}]  }
   0x1   :  { %9 = vsyncpa [#allocation7], 0 }
   0x2   :  { %10 = vsyncpa [#allocation5], 0  ;;  %s308_s12 = smov [#allocation3]   ;;  %s309_s14 = smov [#allocation6]  }
   0x3   :  { %s17_s13 = sshll.u32 %s308_s12, 4  ;;  %s26_s15 = sshll.u32 %s309_s14, 4  ;;  %s18_s13 = int_to_ptr.vmem [resolvable:$true] %s17_s13  ;;  %s335_s15 = int_to_ptr.vmem [resolvable:$true] %s26_s15 }
   0x4   :  { %s236_s18 = scalar_lea.hbm %s381_s0, 64 }
   0x5   :  { %p237_p0 = scmp.ne.s32.totalorder %s381_s0, %s236_s18  ;;  %p240_p1 = scmp.lt.u32.totalorder %s236_s18, %s381_s0 }
   0x7   :  { %p242_p2 = pnand %p240_p1, %p237_p0 }
   0x9   :  { %245 = shalt.err (!%p242_p2)
}
   0xa   :  { %s246_s23 = scalar_lea.vmem %s18_s13, 64  ;;  %p251_p4 = scmp.lt.s32.totalorder %s18_s13, %s18_s13 }
   0xb   :  { %p247_p3 = scmp.ne.s32.totalorder %s18_s13, %s246_s23  ;;  %p252_p5 = scmp.lt.s32.totalorder %s246_s23, %s246_s23 }
   0xd   :  { %p253_p6 = por %p252_p5, %p251_p4 }
   0xf   :  { %p254_p7 = pnand %p253_p6, %p247_p3 }
  0x11   :  { %257 = shalt.err (!%p254_p7)
}
  0x12   :  { %20 = dma.hbm_to_vmem [thread:$0]  %s381_s0, 64, %s18_s13, [#allocation4]  }
  0x13   :  { %s258_s28 = scalar_lea.hbm %s382_s1, 1024 }
  0x14   :  { %p259_p8 = scmp.ne.s32.totalorder %s382_s1, %s258_s28  ;;  %p262_p9 = scmp.lt.u32.totalorder %s258_s28, %s382_s1 }
  0x16   :  { %p264_p10 = pnand %p262_p9, %p259_p8 }
  0x18   :  { %267 = shalt.err (!%p264_p10)
}
  0x19   :  { %s268_s6 = scalar_lea.vmem %s335_s15, 1024  ;;  %p273_p12 = scmp.lt.s32.totalorder %s335_s15, %s335_s15 }
  0x1a   :  { %p269_p11 = scmp.ne.s32.totalorder %s335_s15, %s268_s6  ;;  %p274_p13 = scmp.lt.s32.totalorder %s268_s6, %s268_s6 }
  0x1c   :  { %p275_p0 = por %p274_p13, %p273_p12 }
  0x1e   :  { %p276_p1 = pnand %p275_p0, %p269_p11 }
  0x20   :  { %279 = shalt.err (!%p276_p1)
}
  0x21   :  { %s310_s0 = smov 64   ;;  %s311_s7 = smov 4  }
  0x22   :  { %32 = dma.hbm_to_vmem [thread:$0]  %s382_s1, 1024, %s335_s15, [#allocation7], %s310_s0, %s310_s0, %s311_s7  }
  0x23   :  { %302 = dma.done.wait [#allocation4], 64  }
  0x24   :  { %303 = vsyncadd [#allocation4], 4294967232 }
  0x25   :  { %304 = dma.done.wait [#allocation7], 1024  }
  0x26   :  { %305 = vsyncadd [#allocation7], 4294966272  ;;  %v312_v0 = vmov 0.0   ;;  %vm313_vm0 = vmmov 0   ;;  %v228_v1 = vld [vmem:[#allocation6] sm:$0xff]   ;;  %v229_v2 = vld [vmem:[#allocation6 + $0x8] sm:$0xff]  }
  0x27   :  { %201 = vmatprep.subr.bf16.mxu0 %v312_v0  ;;  %217 = vmatprep.mubr.msk.bf16.mxu0 %vm313_vm0, %v312_v0  ;;  %v230_v3 = vld [vmem:[#allocation6 + $0x10] sm:$0xff]   ;;  %v231_v4 = vld [vmem:[#allocation6 + $0x18] sm:$0xff]   ;;  %v232_v5 = vld [vmem:[#allocation6 + $0x20] sm:$0xff]   ;;  %s314_s11 = smov [#allocation8]  }
  0x28   :  { %202 = vmatpush3.bf16.msra.mxu0 %v228_v1  ;;  %v233_v6 = vld [vmem:[#allocation6 + $0x28] sm:$0xff]   ;;  %v234_v7 = vld [vmem:[#allocation6 + $0x30] sm:$0xff]   ;;  %v235_v8 = vld [vmem:[#allocation6 + $0x38] sm:$0xff]   ;;  %s173_s12 = sshll.u32 %s314_s11, 4  ;;  %s174_s12 = int_to_ptr.vmem [resolvable:$true] %s173_s12 }
  0x29   :  { %203 = vmatprep.subr.bf16.mxu0 %v312_v0  ;;  %v55_v9 = vld [vmem:[#allocation3] sm:$0xf]  ;;  %s280_s13 = scalar_lea.vmem %s174_s12, 128  ;;  %p285_p3 = scmp.lt.s32.totalorder %s174_s12, %s174_s12 }
  0x2a   :  { %v183_v10 = vld [vmem:[%s383_s2] ss:$0 sm:$0xff]  ;;  %p281_p2 = scmp.ne.s32.totalorder %s174_s12, %s280_s13  ;;  %p286_p4 = scmp.lt.s32.totalorder %s280_s13, %s280_s13 }
  0x2c   :  { %204 = vmatpush3.bf16.msra.mxu0 %v229_v2  ;;  %p287_p5 = por %p286_p4, %p285_p3 }
  0x2d   :  { %205 = vmatprep.subr.bf16.mxu0 %v312_v0 }
  0x2e   :  { %p288_p6 = pnand %p287_p5, %p281_p2 }
  0x30   :  { %206 = vmatpush3.bf16.msra.mxu0 %v230_v3 }
  0x31   :  { %207 = vmatprep.subr.bf16.mxu0 %v312_v0 }
  0x34   :  { %208 = vmatpush3.bf16.msra.mxu0 %v231_v4 }
  0x35   :  { %209 = vmatprep.subr.bf16.mxu0 %v312_v0 }
  0x38   :  { %210 = vmatpush3.bf16.msra.mxu0 %v232_v5 }
  0x39   :  { %211 = vmatprep.subr.bf16.mxu0 %v312_v0 }
  0x3c   :  { %212 = vmatpush3.bf16.msra.mxu0 %v233_v6 }
  0x3d   :  { %213 = vmatprep.subr.bf16.mxu0 %v312_v0 }
  0x40   :  { %214 = vmatpush3.bf16.msra.mxu0 %v234_v7 }
  0x41   :  { %215 = vmatprep.subr.bf16.mxu0 %v312_v0 }
  0x44   :  { %216 = vmatpush3.bf16.msra.mxu0 %v235_v8 }
  0x47   :  { %218 = vmatmul.mubr.bf16.vlgmr.msra.gmra.mrb[0].mxu0 %v55_v9 }
 0x11a   :  { %v154_v11 = vpop.f32.mrb[0].mxu0 }
 0x11b   :  { %v160_v12 = vadd.f32 %v183_v10, %v154_v11  ;;  %v219_v13 = vpop.f32.mrb[1].mxu0 }
 0x11c   :  { %v157_v14 = vpop.f32.mrb[2].mxu0 }
 0x11d   :  { %166 = vst [vmem:[#allocation8] sm:$0xff] %v160_v12  ;;  %v220_v15 = vpop.f32.mrb[3].mxu0 }
 0x11e   :  { %291 = shalt.err (!%p288_p6)
}
 0x11f   :  { %s292_s2 = scalar_lea.hbm %s384_s3, 128 }
 0x120   :  { %p293_p7 = scmp.ne.s32.totalorder %s384_s3, %s292_s2  ;;  %p296_p8 = scmp.lt.u32.totalorder %s292_s2, %s384_s3 }
 0x122   :  { %p298_p9 = pnand %p296_p8, %p293_p7 }
 0x124   :  { %301 = shalt.err (!%p298_p9)
}
 0x125   :  { %176 = dma.vmem_to_hbm [thread:$0]  %s174_s12, 128, %s384_s3, [#allocation5]  }
 0x126   :  { %306 = dma.done.wait [#allocation5], 128  }
 0x127   :  { %307 = vsyncadd [#allocation5], 4294967168 }
 0x128   :  { %180 = vsyncpa [#allocation4], 1 }
 0x129   :  { %181 = vsyncpa [#allocation7], 1 }
 0x12a   :  { %182 = vsyncpa [#allocation5], 1 }

</bundles_post_ra>
